<compile_context>
chip_gen: v7x
topology: tpu7x:2x2x1
jax: 0.10.0
libtpu: 0.0.40
codegen_flags: <defaults>
</compile_context>

<pallas_src>
import functools

import numpy as np
import jax
import jax.numpy as jnp
from jax.experimental import pallas as pl
from jax.experimental.pallas import tpu as pltpu


# --------------------------------------------------------------------------- #
# Kernel: one (tm, tn) tile of  x @ W_cat + b_cat,  K streamed over grid axis 2
# --------------------------------------------------------------------------- #
def _fused_parallel_linear_kernel(x_ref, w_ref, b_ref, o_ref, acc_ref):
    k = pl.program_id(2)
    prod = jnp.dot(x_ref[...], w_ref[...], preferred_element_type=jnp.float32)

    @pl.when(k == 0)
    def _():                      # first K step: write directly (no zero-init pass)
        acc_ref[...] = prod

    @pl.when(k > 0)
    def _():                      # later K steps: accumulate in f32
        acc_ref[...] += prod

    @pl.when(k == pl.num_programs(2) - 1)
    def _():                      # last K step: add bias, cast, store lane-dense tile
        o_ref[...] = (acc_ref[...] + b_ref[...].astype(jnp.float32)).astype(o_ref.dtype)


# --------------------------------------------------------------------------- #
# Helpers
# --------------------------------------------------------------------------- #
def _round_up(n: int, m: int) -> int:
    return -(-n // m) * m


def _choose_tile(dim: int, preferred: int) -> int:
    """Full dim if it is small, else the preferred (MXU-aligned) tile size."""
    return dim if dim <= preferred else preferred


def _pad_axis(a, axis, target):
    pad = target - a.shape[axis]
    if pad == 0:
        return a
    widths = [(0, 0)] * a.ndim
    widths[axis] = (0, pad)
    return jnp.pad(a, widths)


def prepare_parallel_params(w_stacked, b_stacked, *, param_dtype=jnp.bfloat16):
    """One-time (init-time) fusion of C Linear params into the kernel layout.

    Args:
      w_stacked: (C, d_in, d_out) weights in x@W layout (torch's Linear stores
        (out, in); transpose before calling).
      b_stacked: (C, d_out) or (C, 1, d_out) biases.
      param_dtype: storage/compute dtype for W_cat (bf16 by default).

    Returns:
      (w_cat, b_cat): (d_in, C*d_out) in param_dtype, (1, C*d_out) float32.
      Column c*d_out + f of w_cat/b_cat is component c, output feature f.
    """
    C, d_in, d_out = w_stacked.shape
    if b_stacked.shape == (C, d_out):
        b = b_stacked
    elif b_stacked.shape == (C, 1, d_out):
        b = b_stacked[:, 0, :]
    else:
        raise ValueError(
            f"b_stacked must be (C, d_out) or (C, 1, d_out); got {b_stacked.shape}")
    w_cat = jnp.transpose(w_stacked, (1, 0, 2)).reshape(d_in, C * d_out)
    return w_cat.astype(param_dtype), b.reshape(1, C * d_out).astype(jnp.float32)


# --------------------------------------------------------------------------- #
# Fused forward (hot path): no weight/output layout changes per call
# --------------------------------------------------------------------------- #
@functools.partial(jax.jit, static_argnames=("tm", "tn", "tk", "out_dtype"))
def parallel_forward_fused(x, w_cat, b_cat, *, tm=256, tn=256, tk=2048,
                           out_dtype=None):
    """y = x @ W_cat + b_cat as one lane-dense Pallas matmul.

    Returns the (B, C*d_out) slab (component-major columns); consumers slice
    per-component lazily -- no post-kernel transpose.
    """
    B, d_in = x.shape
    k_dim, N = w_cat.shape
    if k_dim != d_in:
        raise ValueError(f"x K dim {d_in} != w_cat K dim {k_dim}")
    out_dtype = x.dtype if out_dtype is None else out_dtype

    x = x.astype(w_cat.dtype)           # bf16 compute by default (f32 accumulate)

    tm = _choose_tile(B, tm)
    tn = _choose_tile(N, tn)
    tk = _choose_tile(d_in, tk)

    # Zero-pad to tile multiples (no-op when already aligned); padding
    # contributes exact zeros to the reduction and is sliced away below.
    Bp, Np, Kp = _round_up(B, tm), _round_up(N, tn), _round_up(d_in, tk)
    xp = _pad_axis(_pad_axis(x, 1, Kp), 0, Bp)
    wp = _pad_axis(_pad_axis(w_cat, 1, Np), 0, Kp)
    bp = _pad_axis(b_cat, 1, Np)

    # N leads so megacore sharding can split the weight stream across
    # TensorCores even when the M (batch) grid extent is 1; K reduction last.
    grid = (Np // tn, Bp // tm, Kp // tk)

    # Deeper buffering on the dominant (weight) DMA stream when the grid is
    # deep enough for the extra look-ahead to matter.
    w_idx = lambda j, i, k: (k, j)
    w_bufs = 2
    if grid[0] * grid[1] * grid[2] >= 3:
        try:
            w_spec = pl.BlockSpec((tk, tn), w_idx, pipeline_mode=pl.Buffered(3))
            w_bufs = 3
        except (TypeError, AttributeError):        # older jax: default pipeline
            w_spec = pl.BlockSpec((tk, tn), w_idx)
    else:
        w_spec = pl.BlockSpec((tk, tn), w_idx)

    # VMEM budget from the actual working set; clamp to a range that is safe
    # on all of v5e / v6e (128 MiB physical) and v7x (64 MiB physical).
    in_b = np.dtype(w_cat.dtype).itemsize
    out_b = np.dtype(out_dtype).itemsize
    need = (2 * tm * tk * in_b            # x tiles, double-buffered
            + w_bufs * tk * tn * in_b     # W tiles
            + 2 * 8 * tn * 4              # bias rows (sublane-padded)
            + 2 * tm * tn * out_b         # output tiles
            + tm * tn * 4)                # f32 accumulator
    vmem_limit = int(min(64 * 2**20, max(32 * 2**20, 2 * need)))

    out = pl.pallas_call(
        _fused_parallel_linear_kernel,
        out_shape=jax.ShapeDtypeStruct((Bp, Np), out_dtype),
        grid_spec=pltpu.PrefetchScalarGridSpec(
            num_scalar_prefetch=0,
            grid=grid,
            in_specs=[
                pl.BlockSpec((tm, tk), lambda j, i, k: (i, k)),   # x tile
                w_spec,                                           # W_cat tile
                pl.BlockSpec((1, tn), lambda j, i, k: (0, j)),    # bias row
            ],
            out_specs=pl.BlockSpec((tm, tn), lambda j, i, k: (i, j)),
            scratch_shapes=[pltpu.VMEM((tm, tn), jnp.float32)],   # f32 accumulator
        ),
        compiler_params=pltpu.CompilerParams(
            # N/M tiles are independent; K is the reduction (accumulator
            # resident across it).  On v7x, if a trace shows the leading N
            # axis is not actually sharded across the two TensorCores, switch
            # it to pltpu.CORE_PARALLEL.
            dimension_semantics=("parallel", "parallel", "arbitrary"),
            vmem_limit_bytes=vmem_limit,
        ),
    )(xp, wp, bp)

    return out[:B, :N]          # drop padding (no-op when aligned)


# --------------------------------------------------------------------------- #
# Module-contract wrapper
# --------------------------------------------------------------------------- #
class ParallelLinear:
    """JAX analogue of Parallel([Linear, ...]): params fused ONCE at init,
    __call__ returns a list of per-component outputs (the nn.Module contract).
    Hot-path consumers should prefer .stacked() and slice lazily."""

    def __init__(self, w_stacked, b_stacked, *, param_dtype=jnp.bfloat16):
        self.num_components, self.d_in, self.d_out = w_stacked.shape
        self.w_cat, self.b_cat = prepare_parallel_params(
            w_stacked, b_stacked, param_dtype=param_dtype)

    def stacked(self, x, **kw):
        """Lane-dense (B, C*d_out) slab -- no per-component HBM copies."""
        return parallel_forward_fused(x, self.w_cat, self.b_cat, **kw)

    def __call__(self, x, **kw):
        slab = self.stacked(x, **kw)
        d = self.d_out
        return [slab[:, c * d:(c + 1) * d] for c in range(self.num_components)]


# --------------------------------------------------------------------------- #
# Self-test
# --------------------------------------------------------------------------- #
if __name__ == "__main__":
    key = jax.random.PRNGKey(0)

    def make_params(k, C, d_in, d_out, w_scale=0.05, b_scale=0.1):
        kw_, kb_ = jax.random.split(k)
        # torch Linear stores (out, in); transpose to x@W layout (C, in, out).
        w_torch = jax.random.normal(kw_, (C, d_out, d_in), jnp.float32) * w_scale
        b = jax.random.normal(kb_, (C, d_out), jnp.float32) * b_scale
        return jnp.transpose(w_torch, (0, 2, 1)), b

    def reference(x, w_stacked, b_stacked):
        return [x @ w_stacked[c] + b_stacked[c] for c in range(w_stacked.shape[0])]

    k1, k2, k3, k4 = jax.random.split(key, 4)

    # ---- 1) small aligned shapes, f32 params: tight correctness check ---- #
    B, D_IN, D_OUT, C = 8, 32, 32, 4                       # C*D_OUT = 128 lanes
    x = jax.random.normal(k1, (B, D_IN), jnp.float32)
    w_s, b_s = make_params(k2, C, D_IN, D_OUT)
    ref = reference(x, w_s, b_s)

    mod_f32 = ParallelLinear(w_s, b_s, param_dtype=jnp.float32)
    outs = [jax.block_until_ready(o) for o in mod_f32(x)]
    for got, want in zip(outs, ref):
        assert got.shape == (B, D_OUT)
        assert jnp.allclose(got, want, atol=1e-5, rtol=1e-5), "f32 path mismatch"

    # ---- 2) same shapes, default bf16 params (production path) ---- #
    mod_bf16 = ParallelLinear(w_s, b_s)                    # bf16 W_cat, f32 acc
    outs = [jax.block_until_ready(o) for o in mod_bf16(x)]
    for got, want in zip(outs, ref):
        assert jnp.allclose(got.astype(jnp.float32), want, atol=5e-2, rtol=5e-2), \
            "bf16 path mismatch"

    # ---- 3) multi-tile grid: exercises K accumulation + Buffered(3) W stream #
    B3, D_IN3, D_OUT3, C3 = 8, 256, 128, 2                 # grid = (2, 1, 2)
    x3 = jax.random.normal(k3, (B3, D_IN3), jnp.float32)
    w3, b3 = make_params(k4, C3, D_IN3, D_OUT3)
    mod3 = ParallelLinear(w3, b3)
    outs3 = [jax.block_until_ready(o) for o in mod3(x3, tn=128, tk=128)]
    for got, want in zip(outs3, reference(x3, w3, b3)):
        assert got.shape == (B3, D_OUT3)
        assert jnp.allclose(got.astype(jnp.float32), want, atol=5e-2, rtol=5e-2), \
            "tiled bf16 path mismatch"

    # ---- 4) ragged (non-128-aligned) shapes: no divisibility asserts ---- #
    B4, D_IN4, D_OUT4, C4 = 5, 40, 24, 3
    x4 = jax.random.normal(k1, (B4, D_IN4), jnp.float32)
    w4, b4 = make_params(k2, C4, D_IN4, D_OUT4)
    mod4 = ParallelLinear(w4, b4, param_dtype=jnp.float32)
    outs4 = [jax.block_until_ready(o) for o in mod4(x4)]
    for got, want in zip(outs4, reference(x4, w4, b4)):
        assert got.shape == (B4, D_OUT4)
        assert jnp.allclose(got, want, atol=1e-5, rtol=1e-5), "ragged path mismatch"

    print("KERNEL_OK")
</pallas_src>

<mosaic_0001>
module attributes {stable_mosaic.version = 11 : i64} {
  func.func @_fused_parallel_linear_kernel(%arg0: i32, %arg1: i32, %arg2: i32, %arg3: memref<8x32xf32, #tpu.memory_space<vmem>>, %arg4: memref<32x128xf32, #tpu.memory_space<vmem>>, %arg5: memref<1x128xf32, #tpu.memory_space<vmem>>, %arg6: memref<8x128xf32, #tpu.memory_space<vmem>>, %arg7: memref<8x128xf32, #tpu.memory_space<vmem>>) attributes {dimension_semantics = [#tpu.dimension_semantics<parallel>, #tpu.dimension_semantics<parallel>, #tpu.dimension_semantics<arbitrary>], iteration_bounds = array<i64: 1, 1, 1>, scalar_prefetch = 0 : i64, scratch_operands = 1 : i64, tpu.core_type = #tpu.core_type<tc>, window_params = [{transform_indices = @transform_0, window_bounds = array<i64: 8, 32>}, {transform_indices = @transform_1, window_bounds = array<i64: 32, 128>}, {transform_indices = @transform_2, window_bounds = array<i64: 1, 128>}, {transform_indices = @transform_3, window_bounds = array<i64: 8, 128>}]} {
    %c0 = arith.constant 0 : index
    %c0_0 = arith.constant 0 : index
    %0 = vector.load %arg3[%c0, %c0_0] : memref<8x32xf32, #tpu.memory_space<vmem>>, vector<8x32xf32>
    %c0_1 = arith.constant 0 : index
    %c0_2 = arith.constant 0 : index
    %1 = vector.load %arg4[%c0_1, %c0_2] : memref<32x128xf32, #tpu.memory_space<vmem>>, vector<32x128xf32>
    %cst = arith.constant dense<0.000000e+00> : vector<8x128xf32>
    %2 = tpu.matmul %0, %1, %cst {dimension_numbers = #tpu.dot_dimension_numbers<[1], [0], [0], [1], [0, 0, 1, 1], [], []>} : vector<8x32xf32>, vector<32x128xf32>, vector<8x128xf32> -> vector<8x128xf32>
    %c0_i32 = arith.constant 0 : i32
    %3 = arith.cmpi eq, %arg2, %c0_i32 : i32
    %4 = arith.extui %3 : i1 to i32
    %c0_i32_3 = arith.constant 0 : i32
    %5 = arith.cmpi ne, %4, %c0_i32_3 : i32
    scf.if %5 {
      %c0_8 = arith.constant 0 : index
      %c0_9 = arith.constant 0 : index
      %12 = vector.load %arg7[%c0_8, %c0_9] : memref<8x128xf32, #tpu.memory_space<vmem>>, vector<8x128xf32>
      tpu.vector_store %arg7[%c0_8, %c0_9], %2 {strides = array<i32>} : memref<8x128xf32, #tpu.memory_space<vmem>>, vector<8x128xf32>,
    } else {
    }
    %c0_i32_4 = arith.constant 0 : i32
    %6 = arith.cmpi sgt, %arg2, %c0_i32_4 : i32
    %7 = arith.extui %6 : i1 to i32
    %c0_i32_5 = arith.constant 0 : i32
    %8 = arith.cmpi ne, %7, %c0_i32_5 : i32
    scf.if %8 {
      %c0_8 = arith.constant 0 : index
      %c0_9 = arith.constant 0 : index
      %12 = vector.load %arg7[%c0_8, %c0_9] : memref<8x128xf32, #tpu.memory_space<vmem>>, vector<8x128xf32>
      %13 = arith.addf %12, %2 : vector<8x128xf32>
      %c0_10 = arith.constant 0 : index
      %c0_11 = arith.constant 0 : index
      %14 = vector.load %arg7[%c0_10, %c0_11] : memref<8x128xf32, #tpu.memory_space<vmem>>, vector<8x128xf32>
      tpu.vector_store %arg7[%c0_10, %c0_11], %13 {strides = array<i32>} : memref<8x128xf32, #tpu.memory_space<vmem>>, vector<8x128xf32>,
    } else {
    }
    %c0_i32_6 = arith.constant 0 : i32
    %9 = arith.cmpi eq, %arg2, %c0_i32_6 : i32
    %10 = arith.extui %9 : i1 to i32
    %c0_i32_7 = arith.constant 0 : i32
    %11 = arith.cmpi ne, %10, %c0_i32_7 : i32
    scf.if %11 {
      %c0_8 = arith.constant 0 : index
      %c0_9 = arith.constant 0 : index
      %12 = vector.load %arg7[%c0_8, %c0_9] : memref<8x128xf32, #tpu.memory_space<vmem>>, vector<8x128xf32>
      %c0_10 = arith.constant 0 : index
      %c0_11 = arith.constant 0 : index
      %13 = vector.load %arg5[%c0_10, %c0_11] : memref<1x128xf32, #tpu.memory_space<vmem>>, vector<1x128xf32>
      %14 = vector.broadcast %13 : vector<1x128xf32> to vector<8x128xf32>
      %15 = arith.addf %12, %14 : vector<8x128xf32>
      %c0_12 = arith.constant 0 : index
      %c0_13 = arith.constant 0 : index
      %16 = vector.load %arg6[%c0_12, %c0_13] : memref<8x128xf32, #tpu.memory_space<vmem>>, vector<8x128xf32>
      tpu.vector_store %arg6[%c0_12, %c0_13], %15 {strides = array<i32>} : memref<8x128xf32, #tpu.memory_space<vmem>>, vector<8x128xf32>,
    } else {
    }
    return
  }
  func.func @transform_0(%arg0: i32, %arg1: i32, %arg2: i32) -> (i32, i32) {
    %c0_i32 = arith.constant 0 : i32
    return %arg1, %arg2 : i32, i32
  }
  func.func @transform_1(%arg0: i32, %arg1: i32, %arg2: i32) -> (i32, i32) {
    %c0_i32 = arith.constant 0 : i32
    return %arg2, %arg0 : i32, i32
  }
  func.func @transform_2(%arg0: i32, %arg1: i32, %arg2: i32) -> (i32, i32) {
    %c0_i32 = arith.constant 0 : i32
    %c0_i32_0 = arith.constant 0 : i32
    return %c0_i32, %arg0 : i32, i32
  }
  func.func @transform_3(%arg0: i32, %arg1: i32, %arg2: i32) -> (i32, i32) {
    %c0_i32 = arith.constant 0 : i32
    return %arg1, %arg0 : i32, i32
  }
}

</mosaic_0001>

<bundles_post_ra>
// kernel: parallel_forward_fused.1
= control target key start
LH: loop header
LB: loop body
LE: loop exit
PB: predicated region body
PF: predicated region fallthrough
CT: control target
= control target key end

     0   :  { %8 = vsyncpa [#allocation4], 0  ;;  %s339_s0 = inlined_call_operand.hbm [shape: f32[8,32], index: 0, kind: input, shape index: {}]   ;;  %s340_s1 = inlined_call_operand.hbm [shape: f32[32,128], index: 1, kind: input, shape index: {}]   ;;  %s341_s2 = inlined_call_operand.vmem [shape: f32[1,128], index: 2, kind: input, shape index: {}]   ;;  %s342_s3 = inlined_call_operand.hbm [shape: f32[8,128], index: 3, kind: output, shape index: {}]  }
   0x1   :  { %9 = vsyncpa [#allocation7], 0 }
   0x2   :  { %10 = vsyncpa [#allocation5], 0  ;;  %s265_s12 = smov [#allocation3]   ;;  %s266_s14 = smov [#allocation6]  }
   0x3   :  { %s17_s13 = sshll.u32 %s265_s12, 4  ;;  %s26_s15 = sshll.u32 %s266_s14, 4  ;;  %s18_s13 = int_to_ptr.vmem [resolvable:$true] %s17_s13  ;;  %s293_s15 = int_to_ptr.vmem [resolvable:$true] %s26_s15 }
   0x4   :  { %s193_s18 = scalar_lea.hbm %s339_s0, 128 }
   0x5   :  { %p194_p0 = scmp.ne.s32.totalorder %s339_s0, %s193_s18  ;;  %p197_p1 = scmp.lt.u32.totalorder %s193_s18, %s339_s0 }
   0x7   :  { %p199_p2 = pnand %p197_p1, %p194_p0 }
   0x9   :  { %202 = shalt.err (!%p199_p2)
}
   0xa   :  { %s203_s23 = scalar_lea.vmem %s18_s13, 128  ;;  %p208_p4 = scmp.lt.s32.totalorder %s18_s13, %s18_s13 }
   0xb   :  { %p204_p3 = scmp.ne.s32.totalorder %s18_s13, %s203_s23  ;;  %p209_p5 = scmp.lt.s32.totalorder %s203_s23, %s203_s23 }
   0xd   :  { %p210_p6 = por %p209_p5, %p208_p4 }
   0xf   :  { %p211_p7 = pnand %p210_p6, %p204_p3 }
  0x11   :  { %214 = shalt.err (!%p211_p7)
}
  0x12   :  { %20 = dma.hbm_to_vmem [thread:$0]  %s339_s0, 128, %s18_s13, [#allocation4]  }
  0x13   :  { %s215_s28 = scalar_lea.hbm %s340_s1, 512 }
  0x14   :  { %p216_p8 = scmp.ne.s32.totalorder %s340_s1, %s215_s28  ;;  %p219_p9 = scmp.lt.u32.totalorder %s215_s28, %s340_s1 }
  0x16   :  { %p221_p10 = pnand %p219_p9, %p216_p8 }
  0x18   :  { %224 = shalt.err (!%p221_p10)
}
  0x19   :  { %s225_s6 = scalar_lea.vmem %s293_s15, 512  ;;  %p230_p12 = scmp.lt.s32.totalorder %s293_s15, %s293_s15 }
  0x1a   :  { %p226_p11 = scmp.ne.s32.totalorder %s293_s15, %s225_s6  ;;  %p231_p13 = scmp.lt.s32.totalorder %s225_s6, %s225_s6 }
  0x1c   :  { %p232_p0 = por %p231_p13, %p230_p12 }
  0x1e   :  { %p233_p1 = pnand %p232_p0, %p226_p11 }
  0x20   :  { %236 = shalt.err (!%p233_p1)
}
  0x21   :  { %s267_s0 = smov 128   ;;  %s268_s7 = smov 8  }
  0x22   :  { %32 = dma.hbm_to_vmem [thread:$0]  %s340_s1, 512, %s293_s15, [#allocation7], %s267_s0, %s267_s0, %s268_s7  }
  0x23   :  { %259 = dma.done.wait [#allocation4], 128  }
  0x24   :  { %260 = vsyncadd [#allocation4], 4294967168 }
  0x25   :  { %261 = dma.done.wait [#allocation7], 512  }
  0x26   :  { %262 = vsyncadd [#allocation7], 4294966784  ;;  %v269_v0 = vmov 0.0|0.0   ;;  %vm270_vm0 = vmmov 0   ;;  %v271_v1 = vmov 0.0   ;;  %v42_v2 = vld [vmem:[#allocation6] sm:$0xff] }
  0x27   :  { %179 = vmatprep.subr.bf16.mxu0 %v269_v0  ;;  %176 = vmatprep.mubr.msk.f32.mxu0 %vm270_vm0, %v271_v1  ;;  %v43_v3 = vld [vmem:[#allocation6 + $0x8] sm:$0xff]  ;;  %v44_v4 = vld [vmem:[#allocation6 + $0x10] sm:$0xff]  ;;  %v45_v6 = vld [vmem:[#allocation6 + $0x18] sm:$0xff]  ;;  %vm46_vm1 = vcmask 261120   ;;  %s272_s11 = smov [#allocation8]  }
  0x28   :  { %v180_v5 = vpack.c.bf16 %v43_v3, %v42_v2  ;;  %v183_v7 = vpack.c.bf16 %v45_v6, %v44_v4  ;;  %v41_v8 = vld [vmem:[#allocation3] sm:$0xff]  ;;  %s151_s12 = sshll.u32 %s272_s11, 4  ;;  %s152_s12 = int_to_ptr.vmem [resolvable:$true] %s151_s12 }
  0x29   :  { %v162_v9 = vld [vmem:[%s341_s2] ss:$0 sm:$0xff]  ;;  %s237_s13 = scalar_lea.vmem %s152_s12, 128  ;;  %p242_p3 = scmp.lt.s32.totalorder %s152_s12, %s152_s12 }
  0x2a   :  { %181 = vmatpush3.bf16.msra.mxu0 %v180_v5  ;;  %p238_p2 = scmp.ne.s32.totalorder %s152_s12, %s237_s13  ;;  %p243_p4 = scmp.lt.s32.totalorder %s237_s13, %s237_s13 }
  0x2b   :  { %182 = vmatprep.subr.bf16.mxu0 %v269_v0 }
  0x2c   :  { %p244_p5 = por %p243_p4, %p242_p3 }
  0x2e   :  { %184 = vmatpush3.bf16.msra.mxu0 %v183_v7  ;;  %p245_p6 = pnand %p244_p5, %p238_p2 }
  0x31   :  { %177 = vmatmul.mubr.msk.f32.vlgmr.msra.gmra.mrb[0].mxu0 %vm46_vm1, %v41_v8 }
 0x104   :  { %v116_v10 = vpop.f32.mrb[0].mxu0 }
 0x105   :  { %v143_v11 = vadd.f32 %v162_v9, %v116_v10  ;;  %v178_v12 = vpop.f32.mrb[1].mxu0 }
 0x107   :  { %144 = vst [vmem:[#allocation8] sm:$0xff] %v143_v11 }
 0x108   :  { %248 = shalt.err (!%p245_p6)
}
 0x109   :  { %s249_s16 = scalar_lea.hbm %s342_s3, 128 }
 0x10a   :  { %p250_p7 = scmp.ne.s32.totalorder %s342_s3, %s249_s16  ;;  %p253_p8 = scmp.lt.u32.totalorder %s249_s16, %s342_s3 }
 0x10c   :  { %p255_p9 = pnand %p253_p8, %p250_p7 }
 0x10e   :  { %258 = shalt.err (!%p255_p9)
}
 0x10f   :  { %154 = dma.vmem_to_hbm [thread:$0]  %s152_s12, 128, %s342_s3, [#allocation5]  }
 0x110   :  { %263 = dma.done.wait [#allocation5], 128  }
 0x111   :  { %264 = vsyncadd [#allocation5], 4294967168 }
 0x112   :  { %158 = vsyncpa [#allocation4], 1 }
 0x113   :  { %159 = vsyncpa [#allocation7], 1 }
 0x114   :  { %160 = vsyncpa [#allocation5], 1 }

</bundles_post_ra>
